<compile_context>
chip_gen: v7x
topology: tpu7x:2x2x1
jax: 0.10.0
libtpu: 0.0.40
codegen_flags: <defaults>
</compile_context>

<pallas_src>
import jax
import jax.numpy as jnp
from jax.experimental import pallas as pl
from jax.experimental.pallas import tpu as pltpu

LANE = 128
SUB_BF16 = 16           # bf16 vreg is (16, 128)
H1, H1_PAD = 400, 512
H2, H2_PAD = 300, 384


def _round_up(x, m):
    return (x + m - 1) // m * m


def _pad_feature_dim(d):
    """Pad the input-feature dim: small observation vectors only to the bf16
    sublane multiple (block == full array dim, so the (8,128) rule still
    holds); larger dims lane-aligned to 128."""
    d = max(d, 1)
    return _round_up(d, SUB_BF16) if d < LANE else _round_up(d, LANE)


def _choose_batch_tile(B):
    if B >= 1024:
        return 512
    if B >= 256:
        return 128
    if B >= 64:
        # Two tiles -> the "parallel" batch axis shards across both v7x TCs.
        return _round_up((B + 1) // 2, SUB_BF16)
    return _round_up(B, SUB_BF16)


def _actor_kernel(ma_ref, s_ref, w1_ref, b1_ref, w2_ref, b2_ref,
                  w3_ref, b3_ref, out_ref):
    max_action = ma_ref[0, 0]                                         # SMEM scalar
    x = s_ref[...]                                                    # (TB, Dp) bf16

    h1 = jnp.dot(x, w1_ref[...], preferred_element_type=jnp.float32) + b1_ref[...]
    h1 = jnp.maximum(h1, 0.0).astype(jnp.bfloat16)                    # (TB, 512)

    h2 = jnp.dot(h1, w2_ref[...], preferred_element_type=jnp.float32) + b2_ref[...]
    h2 = jnp.maximum(h2, 0.0).astype(jnp.bfloat16)                    # (TB, 384)

    mu = jnp.dot(h2, w3_ref[...], preferred_element_type=jnp.float32) + b3_ref[...]
    # TODO(synk): bf16 tanh on v6e/v7x (bf16 EUP); f32 kept for v5e parity.
    out_ref[...] = max_action * jnp.tanh(mu)                          # (TB, A_pad) f32


def actor_forward(state, params, max_action):
    """state: (B, input_dims) f32. params: padded bf16 weights / f32 row biases."""
    B, D = state.shape
    n_actions = params["n_actions"]
    Dp = params["w1"].shape[0]
    A_pad = params["w3"].shape[1]

    TB = _choose_batch_tile(B)
    B_pad = _round_up(B, TB)

    # Fused cast + zero-pad (single XLA op; zero rows/cols keep the math exact).
    x = jax.lax.pad(state.astype(jnp.bfloat16), jnp.zeros((), jnp.bfloat16),
                    ((0, B_pad - B, 0), (0, Dp - D, 0)))

    ma = jnp.full((1, 1), max_action, jnp.float32)

    const2d = lambda shape: pl.BlockSpec(shape, lambda i: (0, 0))

    out_pad = pl.pallas_call(
        _actor_kernel,
        out_shape=jax.ShapeDtypeStruct((B_pad, A_pad), jnp.float32),
        grid=(B_pad // TB,),
        in_specs=[
            pl.BlockSpec(memory_space=pltpu.MemorySpace.SMEM),        # max_action
            pl.BlockSpec((TB, Dp), lambda i: (i, 0)),                 # state tile
            const2d(params["w1"].shape), const2d(params["b1"].shape),
            const2d(params["w2"].shape), const2d(params["b2"].shape),
            const2d(params["w3"].shape), const2d(params["b3"].shape),
        ],
        out_specs=pl.BlockSpec((TB, A_pad), lambda i: (i, 0)),
        compiler_params=pltpu.CompilerParams(
            dimension_semantics=("parallel",)),
    )(ma, x, params["w1"], params["b1"], params["w2"], params["b2"],
      params["w3"], params["b3"])

    return out_pad[:B, :n_actions]


def init_actor_params(key, input_dims, n_actions):
    """PyTorch nn.Linear-style init U(-1/sqrt(fan_in), 1/sqrt(fan_in)),
    stored transposed to (in, out), zero-padded to TPU-friendly shapes,
    weights cast to bf16 (biases stay f32)."""
    Dp = _pad_feature_dim(input_dims)
    A_pad = _round_up(max(n_actions, 1), LANE)       # lane-dense output store
    dims = [(input_dims, Dp, H1, H1_PAD),
            (H1, H1_PAD, H2, H2_PAD),
            (H2, H2_PAD, n_actions, A_pad)]
    params = {"n_actions": n_actions, "input_dims": input_dims}
    for i, (fi, fip, fo, fop) in enumerate(dims, start=1):
        key, kw, kb = jax.random.split(key, 3)
        bound = 1.0 / float(fi) ** 0.5
        w = jax.random.uniform(kw, (fi, fo), jnp.float32, minval=-bound, maxval=bound)
        b = jax.random.uniform(kb, (1, fo), jnp.float32, minval=-bound, maxval=bound)
        w_pad = jnp.zeros((fip, fop), jnp.float32).at[:fi, :fo].set(w)
        b_pad = jnp.zeros((1, fop), jnp.float32).at[:, :fo].set(b)
        params[f"w{i}"] = w_pad.astype(jnp.bfloat16)
        params[f"b{i}"] = b_pad
    return params


def actor_forward_ref(state, params, max_action):
    """Pure-JAX reference mirroring the kernel's mixed precision
    (bf16 operands, f32 accumulation/bias)."""
    B, D = state.shape
    n_actions = params["n_actions"]
    Dp = params["w1"].shape[0]
    x = jnp.zeros((B, Dp), jnp.float32).at[:, :D].set(
        state.astype(jnp.bfloat16).astype(jnp.float32))
    w1 = params["w1"].astype(jnp.float32)
    w2 = params["w2"].astype(jnp.float32)
    w3 = params["w3"].astype(jnp.float32)
    h1 = jax.nn.relu(x @ w1 + params["b1"])
    h1 = h1.astype(jnp.bfloat16).astype(jnp.float32)
    h2 = jax.nn.relu(h1 @ w2 + params["b2"])
    h2 = h2.astype(jnp.bfloat16).astype(jnp.float32)
    out = max_action * jnp.tanh(h2 @ w3 + params["b3"])
    return out[:, :n_actions]


if __name__ == "__main__":
    key = jax.random.PRNGKey(0)
    batch = 2
    input_dims = 8          # small continuous-control observation vector
    n_actions = 4
    max_action = 2.0

    k_state, k_params = jax.random.split(key)
    state = jax.random.normal(k_state, (batch, input_dims), jnp.float32)
    params = init_actor_params(k_params, input_dims, n_actions)

    out = actor_forward(state, params, max_action)
    out = jax.block_until_ready(out)

    ref = actor_forward_ref(state, params, max_action)
    assert out.shape == (batch, n_actions)
    assert jnp.allclose(out, ref, atol=2e-2, rtol=2e-2), "mismatch vs reference"
    assert bool(jnp.all(jnp.abs(out) <= max_action + 1e-4))

    print("KERNEL_OK")
</pallas_src>

<mosaic_0001>
module attributes {stable_mosaic.version = 11 : i64} {
  func.func @_actor_kernel(%arg0: i32, %arg1: memref<1x1xf32, #tpu.memory_space<smem>>, %arg2: memref<16x16xbf16, #tpu.memory_space<vmem>>, %arg3: memref<16x512xbf16, #tpu.memory_space<vmem>>, %arg4: memref<1x512xf32, #tpu.memory_space<vmem>>, %arg5: memref<512x384xbf16, #tpu.memory_space<vmem>>, %arg6: memref<1x384xf32, #tpu.memory_space<vmem>>, %arg7: memref<384x128xbf16, #tpu.memory_space<vmem>>, %arg8: memref<1x128xf32, #tpu.memory_space<vmem>>, %arg9: memref<16x128xf32, #tpu.memory_space<vmem>>) attributes {dimension_semantics = [#tpu.dimension_semantics<parallel>], iteration_bounds = array<i64: 1>, scalar_prefetch = 0 : i64, scratch_operands = 0 : i64, tpu.core_type = #tpu.core_type<tc>, window_params = [{transform_indices = @transform_0, window_bounds = array<i64: 1, 1>}, {transform_indices = @transform_1, window_bounds = array<i64: 16, 16>}, {pipeline_mode = #tpu.pipeline_mode<synchronous>, transform_indices = @transform_2, window_bounds = array<i64: 16, 512>}, {pipeline_mode = #tpu.pipeline_mode<synchronous>, transform_indices = @transform_3, window_bounds = array<i64: 1, 512>}, {pipeline_mode = #tpu.pipeline_mode<synchronous>, transform_indices = @transform_4, window_bounds = array<i64: 512, 384>}, {pipeline_mode = #tpu.pipeline_mode<synchronous>, transform_indices = @transform_5, window_bounds = array<i64: 1, 384>}, {pipeline_mode = #tpu.pipeline_mode<synchronous>, transform_indices = @transform_6, window_bounds = array<i64: 384, 128>}, {pipeline_mode = #tpu.pipeline_mode<synchronous>, transform_indices = @transform_7, window_bounds = array<i64: 1, 128>}, {transform_indices = @transform_8, window_bounds = array<i64: 16, 128>}]} {
    %c0 = arith.constant 0 : index
    %c0_0 = arith.constant 0 : index
    %0 = memref.load %arg1[%c0, %c0_0] : memref<1x1xf32, #tpu.memory_space<smem>>
    %c0_1 = arith.constant 0 : index
    %c0_2 = arith.constant 0 : index
    %1 = vector.load %arg2[%c0_1, %c0_2] : memref<16x16xbf16, #tpu.memory_space<vmem>>, vector<16x16xbf16>
    %c0_3 = arith.constant 0 : index
    %c0_4 = arith.constant 0 : index
    %2 = vector.load %arg3[%c0_3, %c0_4] : memref<16x512xbf16, #tpu.memory_space<vmem>>, vector<16x512xbf16>
    %cst = arith.constant dense<0.000000e+00> : vector<16x512xf32>
    %3 = tpu.matmul %1, %2, %cst {dimension_numbers = #tpu.dot_dimension_numbers<[1], [0], [0], [1], [0, 0, 1, 1], [], []>} : vector<16x16xbf16>, vector<16x512xbf16>, vector<16x512xf32> -> vector<16x512xf32>
    %c0_5 = arith.constant 0 : index
    %c0_6 = arith.constant 0 : index
    %4 = vector.load %arg4[%c0_5, %c0_6] : memref<1x512xf32, #tpu.memory_space<vmem>>, vector<1x512xf32>
    %5 = vector.broadcast %4 : vector<1x512xf32> to vector<16x512xf32>
    %6 = arith.addf %3, %5 : vector<16x512xf32>
    %cst_7 = arith.constant 0.000000e+00 : f32
    %7 = vector.broadcast %cst_7 : f32 to vector<16x512xf32>
    %8 = arith.maximumf %6, %7 : vector<16x512xf32>
    %9 = arith.truncf %8 : vector<16x512xf32> to vector<16x512xbf16>
    %c0_8 = arith.constant 0 : index
    %c0_9 = arith.constant 0 : index
    %10 = vector.load %arg5[%c0_8, %c0_9] : memref<512x384xbf16, #tpu.memory_space<vmem>>, vector<512x384xbf16>
    %cst_10 = arith.constant dense<0.000000e+00> : vector<16x384xf32>
    %11 = tpu.matmul %9, %10, %cst_10 {dimension_numbers = #tpu.dot_dimension_numbers<[1], [0], [0], [1], [0, 0, 1, 1], [], []>} : vector<16x512xbf16>, vector<512x384xbf16>, vector<16x384xf32> -> vector<16x384xf32>
    %c0_11 = arith.constant 0 : index
    %c0_12 = arith.constant 0 : index
    %12 = vector.load %arg6[%c0_11, %c0_12] : memref<1x384xf32, #tpu.memory_space<vmem>>, vector<1x384xf32>
    %13 = vector.broadcast %12 : vector<1x384xf32> to vector<16x384xf32>
    %14 = arith.addf %11, %13 : vector<16x384xf32>
    %cst_13 = arith.constant 0.000000e+00 : f32
    %15 = vector.broadcast %cst_13 : f32 to vector<16x384xf32>
    %16 = arith.maximumf %14, %15 : vector<16x384xf32>
    %17 = arith.truncf %16 : vector<16x384xf32> to vector<16x384xbf16>
    %c0_14 = arith.constant 0 : index
    %c0_15 = arith.constant 0 : index
    %18 = vector.load %arg7[%c0_14, %c0_15] : memref<384x128xbf16, #tpu.memory_space<vmem>>, vector<384x128xbf16>
    %cst_16 = arith.constant dense<0.000000e+00> : vector<16x128xf32>
    %19 = tpu.matmul %17, %18, %cst_16 {dimension_numbers = #tpu.dot_dimension_numbers<[1], [0], [0], [1], [0, 0, 1, 1], [], []>} : vector<16x384xbf16>, vector<384x128xbf16>, vector<16x128xf32> -> vector<16x128xf32>
    %c0_17 = arith.constant 0 : index
    %c0_18 = arith.constant 0 : index
    %20 = vector.load %arg8[%c0_17, %c0_18] : memref<1x128xf32, #tpu.memory_space<vmem>>, vector<1x128xf32>
    %21 = vector.broadcast %20 : vector<1x128xf32> to vector<16x128xf32>
    %22 = arith.addf %19, %21 : vector<16x128xf32>
    %23 = math.tanh %22 : vector<16x128xf32>
    %24 = vector.broadcast %0 : f32 to vector<16x128xf32>
    %25 = arith.mulf %24, %23 : vector<16x128xf32>
    %c0_19 = arith.constant 0 : index
    %c0_20 = arith.constant 0 : index
    %26 = vector.load %arg9[%c0_19, %c0_20] : memref<16x128xf32, #tpu.memory_space<vmem>>, vector<16x128xf32>
    tpu.vector_store %arg9[%c0_19, %c0_20], %25 {strides = array<i32>} : memref<16x128xf32, #tpu.memory_space<vmem>>, vector<16x128xf32>,
    return
  }
  func.func @transform_0(%arg0: i32) -> (i32, i32) {
    %c0_i32 = arith.constant 0 : i32
    %c0_i32_0 = arith.constant 0 : i32
    %c0_i32_1 = arith.constant 0 : i32
    return %c0_i32, %c0_i32_0 : i32, i32
  }
  func.func @transform_1(%arg0: i32) -> (i32, i32) {
    %c0_i32 = arith.constant 0 : i32
    %c0_i32_0 = arith.constant 0 : i32
    return %arg0, %c0_i32 : i32, i32
  }
  func.func @transform_2(%arg0: i32) -> (i32, i32) {
    %c0_i32 = arith.constant 0 : i32
    %c0_i32_0 = arith.constant 0 : i32
    %c0_i32_1 = arith.constant 0 : i32
    return %c0_i32, %c0_i32_0 : i32, i32
  }
  func.func @transform_3(%arg0: i32) -> (i32, i32) {
    %c0_i32 = arith.constant 0 : i32
    %c0_i32_0 = arith.constant 0 : i32
    %c0_i32_1 = arith.constant 0 : i32
    return %c0_i32, %c0_i32_0 : i32, i32
  }
  func.func @transform_4(%arg0: i32) -> (i32, i32) {
    %c0_i32 = arith.constant 0 : i32
    %c0_i32_0 = arith.constant 0 : i32
    %c0_i32_1 = arith.constant 0 : i32
    return %c0_i32, %c0_i32_0 : i32, i32
  }
  func.func @transform_5(%arg0: i32) -> (i32, i32) {
    %c0_i32 = arith.constant 0 : i32
    %c0_i32_0 = arith.constant 0 : i32
    %c0_i32_1 = arith.constant 0 : i32
    return %c0_i32, %c0_i32_0 : i32, i32
  }
  func.func @transform_6(%arg0: i32) -> (i32, i32) {
    %c0_i32 = arith.constant 0 : i32
    %c0_i32_0 = arith.constant 0 : i32
    %c0_i32_1 = arith.constant 0 : i32
    return %c0_i32, %c0_i32_0 : i32, i32
  }
  func.func @transform_7(%arg0: i32) -> (i32, i32) {
    %c0_i32 = arith.constant 0 : i32
    %c0_i32_0 = arith.constant 0 : i32
    %c0_i32_1 = arith.constant 0 : i32
    return %c0_i32, %c0_i32_0 : i32, i32
  }
  func.func @transform_8(%arg0: i32) -> (i32, i32) {
    %c0_i32 = arith.constant 0 : i32
    %c0_i32_0 = arith.constant 0 : i32
    return %arg0, %c0_i32 : i32, i32
  }
}

</mosaic_0001>

<bundles_post_ra>
// kernel: tpu_custom_call.1
= control target key start
LH: loop header
LB: loop body
LE: loop exit
PB: predicated region body
PF: predicated region fallthrough
CT: control target
= control target key end

     0   :  { %14 = vsyncpa [#allocation4], 0  ;;  %s2082_s0 = inlined_call_operand.<no memory space> [shape: f32[1,1], index: 0, kind: input, shape index: {}]   ;;  %s2083_s1 = inlined_call_operand.hbm [shape: bf16[16,16], index: 1, kind: input, shape index: {}]   ;;  %s2084_s2 = inlined_call_operand.hbm [shape: bf16[16,512], index: 2, kind: input, shape index: {}]   ;;  %s2085_s3 = inlined_call_operand.vmem [shape: f32[1,512], index: 3, kind: input, shape index: {}]   ;;  %s2086_s4 = inlined_call_operand.hbm [shape: bf16[512,384], index: 4, kind: input, shape index: {}]   ;;  %s2087_s5 = inlined_call_operand.vmem [shape: f32[1,384], index: 5, kind: input, shape index: {}]   ;;  %s2088_s6 = inlined_call_operand.hbm [shape: bf16[384,128], index: 6, kind: input, shape index: {}]   ;;  %s2089_s7 = inlined_call_operand.vmem [shape: f32[1,128], index: 7, kind: input, shape index: {}]   ;;  %s2090_s8 = inlined_call_operand.hbm [shape: f32[16,128], index: 8, kind: output, shape index: {}]  }
   0x1   :  { %15 = vsyncpa [#allocation7], 0 }
   0x2   :  { %16 = vsyncpa [#allocation10], 0 }
   0x3   :  { %17 = vsyncpa [#allocation5], 0  ;;  %s1912_s27 = smov [#allocation6]   ;;  %s1794_s9 = scalar_lea.hbm %s2084_s2, 512 }
   0x4   :  { %s37_s28 = sshll.u32 %s1912_s27, 4  ;;  %p1795_p0 = scmp.ne.s32.totalorder %s2084_s2, %s1794_s9  ;;  %s38_s28 = int_to_ptr.vmem [resolvable:$true] %s37_s28 }
   0x5   :  { %p1798_p1 = scmp.lt.u32.totalorder %s1794_s9, %s2084_s2 }
   0x7   :  { %p1800_p2 = pnand %p1798_p1, %p1795_p0 }
   0x9   :  { %1803 = shalt.err (!%p1800_p2)
}
   0xa   :  { %s1804_s14 = scalar_lea.vmem %s38_s28, 512  ;;  %p1809_p4 = scmp.lt.s32.totalorder %s38_s28, %s38_s28 }
   0xb   :  { %p1805_p3 = scmp.ne.s32.totalorder %s38_s28, %s1804_s14  ;;  %p1810_p5 = scmp.lt.s32.totalorder %s1804_s14, %s1804_s14 }
   0xd   :  { %p1811_p6 = por %p1810_p5, %p1809_p4 }
   0xf   :  { %p1812_p7 = pnand %p1811_p6, %p1805_p3 }
  0x11   :  { %1815 = shalt.err (!%p1812_p7)
}
  0x12   :  { %s1913_s15 = smov 256   ;;  %s1914_s16 = smov 16  }
  0x13   :  { %43 = dma.hbm_to_vmem [thread:$0]  %s2084_s2, 512, %s38_s28, [#allocation7], %s1913_s15, %s1913_s15, %s1914_s16  }
  0x14   :  { %s1915_s19 = smov [#allocation3]   ;;  %s1816_s23 = scalar_lea.hbm %s2083_s1, 128 }
  0x15   :  { %s25_s20 = sshll.u32 %s1915_s19, 4  ;;  %p1817_p8 = scmp.ne.s32.totalorder %s2083_s1, %s1816_s23  ;;  %s26_s20 = int_to_ptr.vmem [resolvable:$true] %s25_s20 }
  0x16   :  { %p1820_p9 = scmp.lt.u32.totalorder %s1816_s23, %s2083_s1 }
  0x18   :  { %p1822_p10 = pnand %p1820_p9, %p1817_p8 }
  0x1a   :  { %1825 = shalt.err (!%p1822_p10)
}
  0x1b   :  { %s1826_s29 = scalar_lea.vmem %s26_s20, 128  ;;  %p1831_p12 = scmp.lt.s32.totalorder %s26_s20, %s26_s20 }
  0x1c   :  { %p1827_p11 = scmp.ne.s32.totalorder %s26_s20, %s1826_s29  ;;  %p1832_p13 = scmp.lt.s32.totalorder %s1826_s29, %s1826_s29 }
  0x1e   :  { %p1833_p0 = por %p1832_p13, %p1831_p12 }
  0x20   :  { %p1834_p1 = pnand %p1833_p0, %p1827_p11 }
  0x22   :  { %1837 = shalt.err (!%p1834_p1)
}
  0x23   :  { %s1916_s2 = smov 64   ;;  %s1917_s28 = smov 4  }
  0x24   :  { %31 = dma.hbm_to_vmem [thread:$0]  %s2083_s1, 128, %s26_s20, [#allocation4], %s1916_s2, %s1916_s2, %s1917_s28  }
  0x25   :  { %s1918_s10 = smov [#allocation8]   ;;  %s1838_s14 = scalar_lea.hbm %s2086_s4, 12288 }
  0x26   :  { %s51_s11 = sshll.u32 %s1918_s10, 4  ;;  %p1839_p2 = scmp.ne.s32.totalorder %s2086_s4, %s1838_s14  ;;  %s52_s11 = int_to_ptr.vmem [resolvable:$true] %s51_s11 }
  0x27   :  { %p1842_p3 = scmp.lt.u32.totalorder %s1838_s14, %s2086_s4 }
  0x29   :  { %p1844_p4 = pnand %p1842_p3, %p1839_p2 }
  0x2b   :  { %1847 = shalt.err (!%p1844_p4)
}
  0x2c   :  { %s1848_s19 = scalar_lea.vmem %s52_s11, 12288  ;;  %p1853_p6 = scmp.lt.s32.totalorder %s52_s11, %s52_s11 }
  0x2d   :  { %p1849_p5 = scmp.ne.s32.totalorder %s52_s11, %s1848_s19  ;;  %p1854_p7 = scmp.lt.s32.totalorder %s1848_s19, %s1848_s19 }
  0x2f   :  { %p1855_p8 = por %p1854_p7, %p1853_p6 }
  0x31   :  { %p1856_p9 = pnand %p1855_p8, %p1849_p5 }
  0x33   :  { %1859 = shalt.err (!%p1856_p9)
}
  0x34   :  { %s1919_s1 = smov 192   ;;  %s1920_s20 = smov 12  }
  0x35   :  { %57 = dma.hbm_to_vmem [thread:$0]  %s2086_s4, 12288, %s52_s11, [#allocation7], %s1919_s1, %s1919_s1, %s1920_s20  }
  0x36   :  { %s1921_s23 = smov [#allocation9]   ;;  %s1860_s27 = scalar_lea.hbm %s2088_s6, 3072 }
  0x37   :  { %s65_s24 = sshll.u32 %s1921_s23, 4  ;;  %p1861_p10 = scmp.ne.s32.totalorder %s2088_s6, %s1860_s27  ;;  %s66_s24 = int_to_ptr.vmem [resolvable:$true] %s65_s24 }
  0x38   :  { %p1864_p11 = scmp.lt.u32.totalorder %s1860_s27, %s2088_s6 }
  0x3a   :  { %p1866_p12 = pnand %p1864_p11, %p1861_p10 }
  0x3c   :  { %1869 = shalt.err (!%p1866_p12)
}
  0x3d   :  { %s1870_s12 = scalar_lea.vmem %s66_s24, 3072  ;;  %p1875_p0 = scmp.lt.s32.totalorder %s66_s24, %s66_s24 }
  0x3e   :  { %p1871_p13 = scmp.ne.s32.totalorder %s66_s24, %s1870_s12  ;;  %p1876_p1 = scmp.lt.s32.totalorder %s1870_s12, %s1870_s12 }
  0x40   :  { %p1877_p2 = por %p1876_p1, %p1875_p0 }
  0x42   :  { %p1878_p3 = pnand %p1877_p2, %p1871_p13 }
  0x44   :  { %1881 = shalt.err (!%p1878_p3)
}
  0x45   :  { %71 = dma.hbm_to_vmem [thread:$0]  %s2088_s6, 3072, %s66_s24, [#allocation10], %s1916_s2, %s1916_s2, %s1917_s28  }
  0x46   :  { %1904 = dma.done.wait [#allocation4], 128  }
  0x47   :  { %1905 = vsyncadd [#allocation4], 4294967168 }
  0x48   :  { %1906 = dma.done.wait [#allocation7], 12800  }
  0x49   :  { %1907 = vsyncadd [#allocation7], 4294954496 }
  0x4a   :  { %1908 = dma.done.wait [#allocation10], 3072  }
  0x4b   :  { %1909 = vsyncadd [#allocation10], 4294964224  ;;  %v1922_v0 = vmov 0   ;;  %v1631_v1 = vld [vmem:[#allocation6 + $0x4] ss:$16 sps:$4 sm:$0xff]   ;;  %v1634_v3 = vld [vmem:[#allocation3] sm:$0xff]   ;;  %v96_v56 = vlaneseq }
  0x4c   :  { %177 = vmatprep.mubr.bf16.mxu0 %v1922_v0  ;;  %220 = vmatprep.mubr.bf16.mxu1 %v1922_v0  ;;  %v1633_v2 = vld [vmem:[#allocation6] ss:$16 sps:$4 sm:$0xff]   ;;  %vm141_vm0 = vcmask 130048   ;;  %v1635_v4 = vld [vmem:[#allocation6 + $0xc] ss:$16 sps:$4 sm:$0xff]   ;;  %vm1924_vm1 = vmmov 0  }
  0x4d   :  { %145 = vmatprep.subr.bf16.mxu0 %v1631_v1  ;;  %v1637_v5 = vld [vmem:[#allocation6 + $0x8] ss:$16 sps:$4 sm:$0xff]   ;;  %v1638_v6 = vld [vmem:[#allocation8] ss:$12 sps:$4 sm:$0xff]   ;;  %v1640_v7 = vld [vmem:[#allocation8 + $0x4] ss:$12 sps:$4 sm:$0xff]   ;;  %188 = vmatprep.subr.bf16.mxu1 %v1635_v4 }
  0x4e   :  { %146 = vmatpush1.bf16.msra.mxu0 %v1633_v2  ;;  %189 = vmatpush1.bf16.msra.mxu1 %v1637_v5  ;;  %v1643_v8 = vld [vmem:[#allocation8 + $0x1c] ss:$12 sps:$4 sm:$0xff]   ;;  %v1641_v9 = vld [vmem:[#allocation8 + $0x18] ss:$12 sps:$4 sm:$0xff]   ;;  %v1646_v10 = vld [vmem:[#allocation8 + $0x34] ss:$12 sps:$4 sm:$0xff]  }
  0x4f   :  { %900 = vmatprep.subr.bf16.mxu0 %v1640_v7  ;;  %v1644_v11 = vld [vmem:[#allocation8 + $0x30] ss:$12 sps:$4 sm:$0xff]   ;;  %v1649_v12 = vld [vmem:[#allocation8 + $0x4c] ss:$12 sps:$4 sm:$0xff]   ;;  %v1647_v13 = vld [vmem:[#allocation8 + $0x48] ss:$12 sps:$4 sm:$0xff]  }
  0x50   :  { %v1652_v14 = vld [vmem:[#allocation8 + $0x64] ss:$12 sps:$4 sm:$0xff]   ;;  %v1665_v15 = vld [vmem:[#allocation8 + $0xc8] ss:$12 sps:$4 sm:$0xff]   ;;  %v1650_v17 = vld [vmem:[#allocation8 + $0x60] ss:$12 sps:$4 sm:$0xff]  }
  0x51   :  { %1389 = vmatmul.mubr.msk.bf16.vlgmr.msra.gmra.mrb[0].mxu0 %vm141_vm0, %v1634_v3  ;;  %1390 = vmatmul.mubr.msk.bf16.vlgmr.msra.gmra.mrb[0].mxu1 %vm141_vm0, %v1634_v3  ;;  %v1666_v16 = vld [vmem:[#allocation8 + $0x8] ss:$12 sps:$4 sm:$0xff]   ;;  %v1670_v18 = vld [vmem:[#allocation8 + $0xe0] ss:$12 sps:$4 sm:$0xff]   ;;  %v1653_v21 = vld [vmem:[#allocation8 + $0x78] ss:$12 sps:$4 sm:$0xff]  }
  0x52   :  { %901 = vmatpush1.bf16.msra.mxu0 %v1638_v6  ;;  %1512 = vmatprep.subr.bf16.mxu1 %v1665_v15  ;;  %v1671_v19 = vld [vmem:[#allocation8 + $0x20] ss:$12 sps:$4 sm:$0xff]   ;;  %v1655_v20 = vld [vmem:[#allocation8 + $0x7c] ss:$12 sps:$4 sm:$0xff]   ;;  %v1675_v22 = vld [vmem:[#allocation8 + $0xf8] ss:$12 sps:$4 sm:$0xff]  }
  0x53   :  { %902 = vmatprep.subr.bf16.mxu0 %v1643_v8  ;;  %1513 = vmatpush3.bf16.msra.mxu1 %v1666_v16  ;;  %v1676_v23 = vld [vmem:[#allocation8 + $0x38] ss:$12 sps:$4 sm:$0xff]   ;;  %v1658_v24 = vld [vmem:[#allocation8 + $0x94] ss:$12 sps:$4 sm:$0xff]   ;;  %v1680_v25 = vld [vmem:[#allocation8 + $0x110] ss:$12 sps:$4 sm:$0xff]  }
  0x54   :  { %1514 = vmatprep.subr.bf16.mxu1 %v1670_v18  ;;  %v1681_v26 = vld [vmem:[#allocation8 + $0x50] ss:$12 sps:$4 sm:$0xff]   ;;  %v1661_v28 = vld [vmem:[#allocation8 + $0xac] ss:$12 sps:$4 sm:$0xff]   ;;  %v1685_v29 = vld [vmem:[#allocation8 + $0x128] ss:$12 sps:$4 sm:$0xff]  }
  0x55   :  { %v1656_v27 = vld [vmem:[#allocation8 + $0x90] ss:$12 sps:$4 sm:$0xff]   ;;  %v1659_v30 = vld [vmem:[#allocation8 + $0xa8] ss:$12 sps:$4 sm:$0xff]   ;;  %v1690_v33 = vld [vmem:[#allocation8 + $0x140] ss:$12 sps:$4 sm:$0xff]  }
  0x56   :  { %903 = vmatpush1.bf16.msra.mxu0 %v1641_v9  ;;  %v1686_v31 = vld [vmem:[#allocation8 + $0x68] ss:$12 sps:$4 sm:$0xff]   ;;  %v1664_v32 = vld [vmem:[#allocation8 + $0xc4] ss:$12 sps:$4 sm:$0xff]   ;;  %v1662_v34 = vld [vmem:[#allocation8 + $0xc0] ss:$12 sps:$4 sm:$0xff]  }
  0x57   :  { %904 = vmatprep.subr.bf16.mxu0 %v1646_v10  ;;  %1515 = vmatpush3.bf16.msra.mxu1 %v1671_v19  ;;  %v1691_v35 = vld [vmem:[#allocation8 + $0x80] ss:$12 sps:$4 sm:$0xff]   ;;  %v1669_v36 = vld [vmem:[#allocation8 + $0xdc] ss:$12 sps:$4 sm:$0xff]   ;;  %v1667_v37 = vld [vmem:[#allocation8 + $0xd8] ss:$12 sps:$4 sm:$0xff]  }
  0x58   :  { %1516 = vmatprep.subr.bf16.mxu1 %v1675_v22  ;;  %v1674_v38 = vld [vmem:[#allocation8 + $0xf4] ss:$12 sps:$4 sm:$0xff]   ;;  %v1672_v39 = vld [vmem:[#allocation8 + $0xf0] ss:$12 sps:$4 sm:$0xff]   ;;  %v1679_v40 = vld [vmem:[#allocation8 + $0x10c] ss:$12 sps:$4 sm:$0xff]  }
  0x59   :  { %v1677_v41 = vld [vmem:[#allocation8 + $0x108] ss:$12 sps:$4 sm:$0xff]   ;;  %v1684_v42 = vld [vmem:[#allocation8 + $0x124] ss:$12 sps:$4 sm:$0xff]   ;;  %v1682_v43 = vld [vmem:[#allocation8 + $0x120] ss:$12 sps:$4 sm:$0xff]  }
  0x5a   :  { %905 = vmatpush1.bf16.msra.mxu0 %v1644_v11  ;;  %v1689_v44 = vld [vmem:[#allocation8 + $0x13c] ss:$12 sps:$4 sm:$0xff]   ;;  %v1687_v45 = vld [vmem:[#allocation8 + $0x138] ss:$12 sps:$4 sm:$0xff]   ;;  %v1694_v46 = vld [vmem:[#allocation8 + $0x154] ss:$12 sps:$4 sm:$0xff]  }
  0x5b   :  { %906 = vmatprep.subr.bf16.mxu0 %v1649_v12  ;;  %1517 = vmatpush3.bf16.msra.mxu1 %v1676_v23  ;;  %v1695_v47 = vld [vmem:[#allocation8 + $0x158] ss:$12 sps:$4 sm:$0xff]   ;;  %v1692_v48 = vld [vmem:[#allocation8 + $0x150] ss:$12 sps:$4 sm:$0xff]   ;;  %v1697_v52 = vld [vmem:[#allocation8 + $0x168] ss:$12 sps:$4 sm:$0xff]  }
  0x5c   :  { %1518 = vmatprep.subr.bf16.mxu1 %v1680_v25  ;;  %v1696_v49 = vld [vmem:[#allocation8 + $0x98] ss:$12 sps:$4 sm:$0xff]   ;;  %v1700_v51 = vld [vmem:[#allocation8 + $0x170] ss:$12 sps:$4 sm:$0xff]   ;;  %v1705_v55 = vld [vmem:[#allocation8 + $0x248] ss:$12 sps:$4 sm:$0xff]  }
  0x5d   :  { %v1699_v50 = vld [vmem:[#allocation8 + $0x16c] ss:$12 sps:$4 sm:$0xff]   ;;  %v1701_v53 = vld [vmem:[#allocation8 + $0xb0] ss:$12 sps:$4 sm:$0xff]   ;;  %v2027_v57 = vshrl.u32 %v96_v56, 7  ;;  %s1925_s16 = smov [#allocation11]  }
  0x5e   :  { %907 = vmatpush1.bf16.msra.mxu0 %v1647_v13  ;;  %v1704_v54 = vld [vmem:[#allocation8 + $0x184] ss:$12 sps:$4 sm:$0xff]   ;;  %v94_v59 = vld [vmem:[%s2085_s3] sm:$0xf]  ;;  %s1370_s17 = sshll.u32 %s1925_s16, 4  ;;  %s1371_s17 = int_to_ptr.vmem [resolvable:$true] %s1370_s17 }
  0x5f   :  { %908 = vmatprep.subr.bf16.mxu0 %v1652_v14  ;;  %1519 = vmatpush3.bf16.msra.mxu1 %v1681_v26  ;;  %v98_v58 = vsub.s32 0, %v2027_v57  ;;  %v102_v60 = vsub.s32 1, %v2027_v57  ;;  %v106_v61 = vsub.s32 2, %v2027_v57  ;;  %v110_v63 = vsub.s32 3, %v2027_v57  ;;  %v1736_v56 = vld [vmem:[#allocation8 + $0x218] ss:$12 sps:$4 sm:$0xff]   ;;  %p1887_p5 = scmp.lt.s32.totalorder %s1371_s17, %s1371_s17 }
  0x60   :  { %1520 = vmatprep.subr.bf16.mxu1 %v1685_v29  ;;  %v1783_v57 = vld [vmem:[#allocation9 + $0x88] sm:$0xff]  }
  0x61   :  { %v99_v62 = vrot.slane %v94_v59, %v98_v58  ;;  %v103_v0 = vrot.slane %v94_v59, %v102_v60  ;;  %v107_v2 = vrot.slane %v94_v59, %v106_v61  ;;  %v111_v5 = vrot.slane %v94_v59, %v110_v63  ;;  %v1739_v59 = vld [vmem:[#allocation8 + $0x22c] ss:$12 sps:$4 sm:$0xff]   ;;  %v1737_v63 = vld [vmem:[#allocation8 + $0x228] ss:$12 sps:$4 sm:$0xff]  }
  0x62   :  { %909 = vmatpush1.bf16.msra.mxu0 %v1650_v17 }
  0x63   :  { %910 = vmatprep.subr.bf16.mxu0 %v1655_v20  ;;  %1521 = vmatpush3.bf16.msra.mxu1 %v1686_v31  ;;  %v1710_v31 = vld [vmem:[#allocation8 + $0x260] ss:$12 sps:$4 sm:$0xff]  }
  0x64   :  { %1522 = vmatprep.subr.bf16.mxu1 %v1690_v33 }
  0x66   :  { %911 = vmatpush1.bf16.msra.mxu0 %v1653_v21 }
  0x67   :  { %912 = vmatprep.subr.bf16.mxu0 %v1658_v24  ;;  %1523 = vmatpush3.bf16.msra.mxu1 %v1691_v35  ;;  %v1707_v35 = vld [vmem:[#allocation8 + $0x198] ss:$12 sps:$4 sm:$0xff]  }
  0x68   :  { %1524 = vmatprep.subr.bf16.mxu1 %v1695_v47  ;;  %v1722_v47 = vld [vmem:[#allocation8 + $0x1e0] ss:$12 sps:$4 sm:$0xff]  }
  0x6a   :  { %913 = vmatpush1.bf16.msra.mxu0 %v1656_v27  ;;  %v1702_v27 = vld [vmem:[#allocation8 + $0x180] ss:$12 sps:$4 sm:$0xff]  }
  0x6b   :  { %914 = vmatprep.subr.bf16.mxu0 %v1661_v28  ;;  %1525 = vmatpush3.bf16.msra.mxu1 %v1696_v49  ;;  %v1706_v28 = vld [vmem:[#allocation8 + $0x188] ss:$12 sps:$4 sm:$0xff]  }
  0x6c   :  { %1526 = vmatprep.subr.bf16.mxu1 %v1700_v51  ;;  %v1729_v49 = vld [vmem:[#allocation8 + $0x1fc] ss:$12 sps:$4 sm:$0xff]   ;;  %v1727_v51 = vld [vmem:[#allocation8 + $0x1f8] ss:$12 sps:$4 sm:$0xff]  }
  0x6e   :  { %915 = vmatpush1.bf16.msra.mxu0 %v1659_v30  ;;  %v1709_v30 = vld [vmem:[#allocation8 + $0x19c] ss:$12 sps:$4 sm:$0xff]  }
  0x6f   :  { %916 = vmatprep.subr.bf16.mxu0 %v1664_v32  ;;  %1527 = vmatpush3.bf16.msra.mxu1 %v1701_v53  ;;  %v1734_v53 = vld [vmem:[#allocation8 + $0x214] ss:$12 sps:$4 sm:$0xff]  }
  0x70   :  { %1534 = vmatprep.subr.bf16.mxu1 %v1705_v55  ;;  %v1732_v55 = vld [vmem:[#allocation8 + $0x210] ss:$12 sps:$4 sm:$0xff]  }
  0x72   :  { %917 = vmatpush1.bf16.msra.mxu0 %v1662_v34 }
  0x73   :  { %918 = vmatprep.subr.bf16.mxu0 %v1669_v36  ;;  %v1711_v36 = vld [vmem:[#allocation8 + $0x1a0] ss:$12 sps:$4 sm:$0xff]  }
  0x76   :  { %919 = vmatpush1.bf16.msra.mxu0 %v1667_v37  ;;  %v1714_v37 = vld [vmem:[#allocation8 + $0x1b4] ss:$12 sps:$4 sm:$0xff]  }
  0x77   :  { %920 = vmatprep.subr.bf16.mxu0 %v1674_v38  ;;  %v1715_v38 = vld [vmem:[#allocation8 + $0x278] ss:$12 sps:$4 sm:$0xff]  }
  0x7a   :  { %921 = vmatpush1.bf16.msra.mxu0 %v1672_v39  ;;  %v1712_v39 = vld [vmem:[#allocation8 + $0x1b0] ss:$12 sps:$4 sm:$0xff]  }
  0x7b   :  { %922 = vmatprep.subr.bf16.mxu0 %v1679_v40  ;;  %v1716_v40 = vld [vmem:[#allocation8 + $0x1b8] ss:$12 sps:$4 sm:$0xff]  }
  0x7e   :  { %923 = vmatpush1.bf16.msra.mxu0 %v1677_v41  ;;  %v1719_v41 = vld [vmem:[#allocation8 + $0x1cc] ss:$12 sps:$4 sm:$0xff]  }
  0x7f   :  { %924 = vmatprep.subr.bf16.mxu0 %v1684_v42  ;;  %v1720_v42 = vld [vmem:[#allocation8 + $0x290] ss:$12 sps:$4 sm:$0xff]  }
  0x82   :  { %925 = vmatpush1.bf16.msra.mxu0 %v1682_v43  ;;  %v1717_v43 = vld [vmem:[#allocation8 + $0x1c8] ss:$12 sps:$4 sm:$0xff]  }
  0x83   :  { %926 = vmatprep.subr.bf16.mxu0 %v1689_v44  ;;  %v1721_v44 = vld [vmem:[#allocation8 + $0x1d0] ss:$12 sps:$4 sm:$0xff]  }
  0x86   :  { %927 = vmatpush1.bf16.msra.mxu0 %v1687_v45  ;;  %v1724_v45 = vld [vmem:[#allocation8 + $0x1e4] ss:$12 sps:$4 sm:$0xff]  }
  0x87   :  { %928 = vmatprep.subr.bf16.mxu0 %v1694_v46  ;;  %v1725_v46 = vld [vmem:[#allocation8 + $0x2a8] ss:$12 sps:$4 sm:$0xff]  }
  0x8a   :  { %929 = vmatpush1.bf16.msra.mxu0 %v1692_v48  ;;  %v1726_v48 = vld [vmem:[#allocation8 + $0x1e8] ss:$12 sps:$4 sm:$0xff]  }
  0x8b   :  { %930 = vmatprep.subr.bf16.mxu0 %v1699_v50  ;;  %v1730_v50 = vld [vmem:[#allocation8 + $0x2c0] ss:$12 sps:$4 sm:$0xff]  }
  0x8e   :  { %931 = vmatpush1.bf16.msra.mxu0 %v1697_v52  ;;  %v1731_v52 = vld [vmem:[#allocation8 + $0x200] ss:$12 sps:$4 sm:$0xff]  }
  0x8f   :  { %943 = vmatprep.subr.bf16.mxu0 %v1704_v54  ;;  %v1735_v54 = vld [vmem:[#allocation8 + $0x2d8] ss:$12 sps:$4 sm:$0xff]  }
 0x124   :  { %v179_v1 = vpop.f32.mrb[0].mxu0  ;;  %v222_v10 = vpop.f32.mrb[0].mxu1 }
 0x125   :  { %v180_v3 = vadd.f32 %v179_v1, %v99_v62  ;;  %v181_v4 = vpop.f32.mrb[1].mxu0  ;;  %v223_v12 = vadd.f32 %v222_v10, %v107_v2  ;;  %v224_v13 = vpop.f32.mrb[1].mxu1  ;;  %v1744_v1 = vld [vmem:[#allocation8 + $0x244] ss:$12 sps:$4 sm:$0xff]   ;;  %v1754_v10 = vld [vmem:[#allocation8 + $0x2a0] ss:$12 sps:$4 sm:$0xff]  }
 0x126   :  { %v182_v6 = vadd.f32 %v181_v4, %v103_v0  ;;  %v183_v7 = vpop.f32.mrb[2].mxu0  ;;  %v225_v16 = vadd.f32 %v224_v13, %v111_v5  ;;  %v226_v17 = vpop.f32.mrb[2].mxu1  ;;  %v1745_v4 = vld [vmem:[#allocation8 + $0x258] ss:$12 sps:$4 sm:$0xff]   ;;  %v1762_v13 = vld [vmem:[#allocation8 + $0x2d4] ss:$12 sps:$4 sm:$0xff]  }
 0x127   :  { %v184_v8 = vadd.f32 %v183_v7, %v99_v62  ;;  %v185_v9 = vpop.f32.mrb[3].mxu0  ;;  %v231_v14 = vmax.f32 %v180_v3, 0.0  ;;  %v233_v20 = vmax.f32 %v223_v12, 0.0  ;;  %v227_v21 = vadd.f32 %v226_v17, %v107_v2  ;;  %v228_v22 = vpop.f32.mrb[3].mxu1  ;;  %v1740_v62 = vld [vmem:[#allocation8 + $0x2f0] ss:$12 sps:$4 sm:$0xff]  }
 0x128   :  { %v186_v11 = vadd.f32 %v185_v9, %v103_v0  ;;  %v232_v18 = vmax.f32 %v182_v6, 0.0  ;;  %v234_v24 = vmax.f32 %v225_v16, 0.0  ;;  %v229_v25 = vadd.f32 %v228_v22, %v111_v5  ;;  %v1741_v0 = vld [vmem:[#allocation8 + $0x230] ss:$12 sps:$4 sm:$0xff]   ;;  %v1742_v2 = vld [vmem:[#allocation8 + $0x240] ss:$12 sps:$4 sm:$0xff]  }
 0x129   :  { %v235_v15 = vmax.f32 %v184_v8, 0.0  ;;  %v237_v29 = vmax.f32 %v227_v21, 0.0  ;;  %v1747_v3 = vld [vmem:[#allocation8 + $0x25c] ss:$12 sps:$4 sm:$0xff]   ;;  %v1750_v5 = vld [vmem:[#allocation8 + $0x274] ss:$12 sps:$4 sm:$0xff]  }
 0x12a   :  { %v236_v19 = vmax.f32 %v186_v11, 0.0  ;;  %v238_v32 = vmax.f32 %v229_v25, 0.0  ;;  %v1748_v6 = vld [vmem:[#allocation8 + $0x270] ss:$12 sps:$4 sm:$0xff]   ;;  %v1753_v7 = vld [vmem:[#allocation8 + $0x28c] ss:$12 sps:$4 sm:$0xff]  }
 0x12b   :  { %v239_v23 = vpack.c.bf16 %v235_v15, %v231_v14  ;;  %v2042_v33 = vpack.c.bf16 %v237_v29, %v233_v20  ;;  %v1751_v8 = vld [vmem:[#allocation8 + $0x288] ss:$12 sps:$4 sm:$0xff]   ;;  %v1756_v9 = vld [vmem:[#allocation8 + $0x2a4] ss:$12 sps:$4 sm:$0xff]   ;;  %v1765_v15 = vld [vmem:[#allocation8 + $0x2ec] ss:$12 sps:$4 sm:$0xff]  }
 0x12c   :  { %v240_v26 = vpack.c.bf16 %v236_v19, %v232_v18  ;;  %v242_v34 = vpack.c.bf16 %v238_v32, %v234_v24  ;;  %v1759_v11 = vld [vmem:[#allocation8 + $0x2bc] ss:$12 sps:$4 sm:$0xff]   ;;  %v1757_v12 = vld [vmem:[#allocation8 + $0x2b8] ss:$12 sps:$4 sm:$0xff]   ;;  %v1770_v21 = vld [vmem:[#allocation9 + $0x50] sm:$0xff]  }
 0x12d   :  { %v1760_v14 = vld [vmem:[#allocation8 + $0x2d0] ss:$12 sps:$4 sm:$0xff]   ;;  %v1763_v16 = vld [vmem:[#allocation8 + $0x2e8] ss:$12 sps:$4 sm:$0xff]   ;;  %v1766_v17 = vld [vmem:[#allocation9 + $0x40] sm:$0xff]  }
 0x12e   :  { %932 = vmatprep.mubr.bf16.mxu0 %v240_v26  ;;  %1018 = vmatprep.mubr.bf16.mxu1 %v240_v26  ;;  %v1767_v18 = vld [vmem:[#allocation9] sm:$0xff]   ;;  %v1768_v19 = vld [vmem:[#allocation9 + $0x48] sm:$0xff]   ;;  %v1771_v22 = vld [vmem:[#allocation9 + $0x10] sm:$0xff]  }
 0x12f   :  { %933 = vmatmul.mubr.bf16.vlgmr.msra.gmra.mrb[4].mxu0 %v239_v23  ;;  %1019 = vmatmul.mubr.bf16.vlgmr.msra.gmra.mrb[4].mxu1 %v239_v23  ;;  %v1769_v20 = vld [vmem:[#allocation9 + $0x8] sm:$0xff]   ;;  %v1772_v23 = vld [vmem:[#allocation9 + $0x58] sm:$0xff]   ;;  %v1774_v25 = vld [vmem:[#allocation9 + $0x60] sm:$0xff]  }
 0x130   :  { %944 = vmatpush1.bf16.msra.mxu0 %v1702_v27  ;;  %1535 = vmatpush3.bf16.msra.mxu1 %v1706_v28  ;;  %v1773_v24 = vld [vmem:[#allocation9 + $0x18] sm:$0xff]   ;;  %v1775_v26 = vld [vmem:[#allocation9 + $0x20] sm:$0xff]   ;;  %v1776_v27 = vld [vmem:[#allocation9 + $0x68] sm:$0xff]  }
 0x131   :  { %945 = vmatprep.subr.bf16.mxu0 %v1709_v30  ;;  %1536 = vmatprep.subr.bf16.mxu1 %v1710_v31  ;;  %v1777_v28 = vld [vmem:[#allocation9 + $0x28] sm:$0xff]   ;;  %v1778_v29 = vld [vmem:[#allocation9 + $0x70] sm:$0xff]   ;;  %v1780_v31 = vld [vmem:[#allocation9 + $0x78] sm:$0xff]  }
 0x132   :  { %1059 = vmatprep.mubr.bf16.mxu1 %v242_v34  ;;  %975 = vmatprep.mubr.bf16.mxu0 %v242_v34  ;;  %v1779_v30 = vld [vmem:[#allocation9 + $0x30] sm:$0xff]   ;;  %v1781_v32 = vld [vmem:[#allocation9 + $0x38] sm:$0xff]  }
 0x134   :  { %946 = vmatpush1.bf16.msra.mxu0 %v1707_v35  ;;  %1537 = vmatpush3.bf16.msra.mxu1 %v1711_v36 }
 0x135   :  { %947 = vmatprep.subr.bf16.mxu0 %v1714_v37  ;;  %1538 = vmatprep.subr.bf16.mxu1 %v1715_v38 }
 0x138   :  { %948 = vmatpush1.bf16.msra.mxu0 %v1712_v39  ;;  %1539 = vmatpush3.bf16.msra.mxu1 %v1716_v40  ;;  %v371_v40 = vld [vmem:[%s2087_s5] sm:$0x7] }
 0x139   :  { %949 = vmatprep.subr.bf16.mxu0 %v1719_v41  ;;  %1540 = vmatprep.subr.bf16.mxu1 %v1720_v42  ;;  %v384_v41 = vrot.slane %v371_v40, %v106_v61 }
 0x13c   :  { %950 = vmatpush1.bf16.msra.mxu0 %v1717_v43  ;;  %1541 = vmatpush3.bf16.msra.mxu1 %v1721_v44 }
 0x13d   :  { %951 = vmatprep.subr.bf16.mxu0 %v1724_v45  ;;  %1542 = vmatprep.subr.bf16.mxu1 %v1725_v46 }
 0x140   :  { %952 = vmatpush1.bf16.msra.mxu0 %v1722_v47  ;;  %1543 = vmatpush3.bf16.msra.mxu1 %v1726_v48 }
 0x141   :  { %953 = vmatprep.subr.bf16.mxu0 %v1729_v49  ;;  %1544 = vmatprep.subr.bf16.mxu1 %v1730_v50 }
 0x144   :  { %954 = vmatpush1.bf16.msra.mxu0 %v1727_v51  ;;  %1545 = vmatpush3.bf16.msra.mxu1 %v1731_v52 }
 0x145   :  { %955 = vmatprep.subr.bf16.mxu0 %v1734_v53  ;;  %1546 = vmatprep.subr.bf16.mxu1 %v1735_v54 }
 0x148   :  { %956 = vmatpush1.bf16.msra.mxu0 %v1732_v55  ;;  %1547 = vmatpush3.bf16.msra.mxu1 %v1736_v56  ;;  %v376_v55 = vrot.slane %v371_v40, %v98_v58  ;;  %v380_v56 = vrot.slane %v371_v40, %v102_v60  ;;  %v1784_v58 = vld [vmem:[#allocation9 + $0x90] sm:$0xff]   ;;  %v1785_v60 = vld [vmem:[#allocation9 + $0x98] sm:$0xff]  }
 0x149   :  { %957 = vmatprep.subr.bf16.mxu0 %v1739_v59  ;;  %1548 = vmatprep.subr.bf16.mxu1 %v1740_v62 }
 0x14c   :  { %958 = vmatpush1.bf16.msra.mxu0 %v1737_v63  ;;  %1549 = vmatpush3.bf16.msra.mxu1 %v1741_v0 }
 0x14d   :  { %959 = vmatprep.subr.bf16.mxu0 %v1744_v1  ;;  %1556 = vmatprep.subr.bf16.mxu1 %v1766_v17 }
 0x14f   :  { %1060 = vmatmul.mubr.bf16.vlgmr.msra.gmra.mrb[8].mxu1 %v2042_v33 }
 0x150   :  { %960 = vmatpush1.bf16.msra.mxu0 %v1742_v2  ;;  %1557 = vmatpush3.bf16.msra.mxu1 %v1767_v18 }
 0x151   :  { %961 = vmatprep.subr.bf16.mxu0 %v1747_v3  ;;  %1558 = vmatprep.subr.bf16.mxu1 %v1768_v19 }
 0x154   :  { %962 = vmatpush1.bf16.msra.mxu0 %v1745_v4  ;;  %1559 = vmatpush3.bf16.msra.mxu1 %v1769_v20 }
 0x155   :  { %963 = vmatprep.subr.bf16.mxu0 %v1750_v5  ;;  %1560 = vmatprep.subr.bf16.mxu1 %v1770_v21  ;;  %v1487_v21 = vld [vmem:[%s2089_s7] ss:$0 sm:$0xff]  ;;  %s1882_s7 = scalar_lea.vmem %s1371_s17, 256 }
 0x156   :  { %p1883_p4 = scmp.ne.s32.totalorder %s1371_s17, %s1882_s7  ;;  %p1888_p6 = scmp.lt.s32.totalorder %s1882_s7, %s1882_s7 }
 0x158   :  { %964 = vmatpush1.bf16.msra.mxu0 %v1748_v6  ;;  %1561 = vmatpush3.bf16.msra.mxu1 %v1771_v22  ;;  %p1889_p7 = por %p1888_p6, %p1887_p5 }
 0x159   :  { %965 = vmatprep.subr.bf16.mxu0 %v1753_v7  ;;  %1562 = vmatprep.subr.bf16.mxu1 %v1772_v23 }
 0x15a   :  { %p1890_p8 = pnand %p1889_p7, %p1883_p4 }
 0x15c   :  { %966 = vmatpush1.bf16.msra.mxu0 %v1751_v8  ;;  %1563 = vmatpush3.bf16.msra.mxu1 %v1773_v24 }
 0x15d   :  { %967 = vmatprep.subr.bf16.mxu0 %v1756_v9  ;;  %1564 = vmatprep.subr.bf16.mxu1 %v1774_v25 }
 0x160   :  { %968 = vmatpush1.bf16.msra.mxu0 %v1754_v10  ;;  %1565 = vmatpush3.bf16.msra.mxu1 %v1775_v26  ;;  %v1782_v10 = vld [vmem:[#allocation9 + $0x80] sm:$0xff]  }
 0x161   :  { %969 = vmatprep.subr.bf16.mxu0 %v1759_v11  ;;  %1566 = vmatprep.subr.bf16.mxu1 %v1776_v27  ;;  %v1786_v11 = vld [vmem:[#allocation9 + $0xa0] sm:$0xff]  }
 0x164   :  { %970 = vmatpush1.bf16.msra.mxu0 %v1757_v12  ;;  %1567 = vmatpush3.bf16.msra.mxu1 %v1777_v28  ;;  %v1787_v12 = vld [vmem:[#allocation9 + $0xa8] sm:$0xff]  }
 0x165   :  { %971 = vmatprep.subr.bf16.mxu0 %v1762_v13  ;;  %1568 = vmatprep.subr.bf16.mxu1 %v1778_v29  ;;  %v1788_v13 = vld [vmem:[#allocation9 + $0xb0] sm:$0xff]  }
 0x168   :  { %972 = vmatpush1.bf16.msra.mxu0 %v1760_v14  ;;  %1569 = vmatpush3.bf16.msra.mxu1 %v1779_v30  ;;  %v1789_v14 = vld [vmem:[#allocation9 + $0xb8] sm:$0xff]   ;;  %v1360_v30 = vstv %s2082_s0 }
 0x169   :  { %973 = vmatprep.subr.bf16.mxu0 %v1765_v15  ;;  %1570 = vmatprep.subr.bf16.mxu1 %v1780_v31 }
 0x16c   :  { %974 = vmatpush1.bf16.msra.mxu0 %v1763_v16  ;;  %1571 = vmatpush3.bf16.msra.mxu1 %v1781_v32 }
 0x16f   :  { %976 = vmatmul.mubr.bf16.vlgmr.msra.gmra.mrb[4].mxu0 %v2042_v33  ;;  %v1923_v33 = vmov 0.0  }
 0x170   :  { %1587 = vmatprep.subr.bf16.mxu1 %v1923_v33 }
 0x202   :  { %v1528_v34 = vpop.f32.mrb[4].mxu1 }
 0x203   :  { %v1529_v35 = vpop.f32.mrb[5].mxu1 }
 0x204   :  { %v1530_v36 = vadd.f32 %v1529_v35, %v1528_v34  ;;  %v1531_v37 = vpop.f32.mrb[6].mxu1 }
 0x205   :  { %v1532_v38 = vpop.f32.mrb[7].mxu1 }
 0x206   :  { %v1533_v39 = vadd.f32 %v1532_v38, %v1531_v37  ;;  %v1021_v44 = vadd.f32 %v1530_v36, %v384_v41 }
 0x208   :  { %v1024_v48 = vadd.f32 %v1533_v39, %v384_v41 }
 0x222   :  { %v1550_v42 = vpop.f32.mrb[8].mxu1 }
 0x223   :  { %v1551_v43 = vpop.f32.mrb[9].mxu1 }
 0x224   :  { %v1552_v45 = vadd.f32 %v1551_v43, %v1550_v42  ;;  %v1553_v46 = vpop.f32.mrb[10].mxu1 }
 0x225   :  { %v1554_v47 = vpop.f32.mrb[11].mxu1 }
 0x226   :  { %v1062_v49 = vadd.f32 %v1552_v45, %v1021_v44  ;;  %v1555_v50 = vadd.f32 %v1554_v47, %v1553_v46 }
 0x228   :  { %v1065_v51 = vadd.f32 %v1555_v50, %v1024_v48  ;;  %v1070_v52 = vmax.f32 %v1062_v49, 0.0 }
 0x22a   :  { %v1073_v53 = vmax.f32 %v1065_v51, 0.0 }
 0x22c   :  { %v1076_v54 = vpack.c.bf16 %v1073_v53, %v1070_v52 }
 0x242   :  { %v977_v61 = vpop.f32.mrb[4].mxu0 }
 0x243   :  { %v1607_v59 = vadd.f32 %v977_v61, %v376_v55  ;;  %v979_v62 = vpop.f32.mrb[5].mxu0 }
 0x244   :  { %v1608_v63 = vadd.f32 %v979_v62, %v380_v56  ;;  %v981_v0 = vpop.f32.mrb[6].mxu0 }
 0x245   :  { %v1609_v1 = vadd.f32 %v981_v0, %v376_v55  ;;  %v983_v2 = vpop.f32.mrb[7].mxu0  ;;  %v1068_v4 = vmax.f32 %v1607_v59, 0.0 }
 0x246   :  { %v1610_v3 = vadd.f32 %v983_v2, %v380_v56  ;;  %v1069_v6 = vmax.f32 %v1608_v63, 0.0 }
 0x247   :  { %v1071_v5 = vmax.f32 %v1609_v1, 0.0 }
 0x248   :  { %v1072_v7 = vmax.f32 %v1610_v3, 0.0 }
 0x249   :  { %v1074_v8 = vpack.c.bf16 %v1071_v5, %v1068_v4 }
 0x24a   :  { %v1075_v9 = vpack.c.bf16 %v1072_v7, %v1069_v6 }
 0x24c   :  { %1308 = vmatprep.mubr.bf16.mxu1 %v1075_v9 }
 0x24d   :  { %1309 = vmatmul.mubr.bf16.vlgmr.msra.gmra.mrb[12].mxu1 %v1074_v8 }
 0x24e   :  { %1588 = vmatpush3.bf16.msra.mxu1 %v1782_v10  ;;  %1603 = vmatprep.mubr.msk.bf16.mxu1 %vm1924_vm1, %v1923_v33 }
 0x24f   :  { %1589 = vmatprep.subr.bf16.mxu1 %v1923_v33 }
 0x252   :  { %1590 = vmatpush3.bf16.msra.mxu1 %v1783_v57 }
 0x253   :  { %1591 = vmatprep.subr.bf16.mxu1 %v1923_v33 }
 0x256   :  { %1592 = vmatpush3.bf16.msra.mxu1 %v1784_v58 }
 0x257   :  { %1593 = vmatprep.subr.bf16.mxu1 %v1923_v33 }
 0x25a   :  { %1594 = vmatpush3.bf16.msra.mxu1 %v1785_v60 }
 0x25b   :  { %1595 = vmatprep.subr.bf16.mxu1 %v1923_v33 }
 0x25e   :  { %1596 = vmatpush3.bf16.msra.mxu1 %v1786_v11 }
 0x25f   :  { %1597 = vmatprep.subr.bf16.mxu1 %v1923_v33 }
 0x262   :  { %1598 = vmatpush3.bf16.msra.mxu1 %v1787_v12 }
 0x263   :  { %1599 = vmatprep.subr.bf16.mxu1 %v1923_v33 }
 0x266   :  { %1600 = vmatpush3.bf16.msra.mxu1 %v1788_v13 }
 0x267   :  { %1601 = vmatprep.subr.bf16.mxu1 %v1923_v33 }
 0x26a   :  { %1602 = vmatpush3.bf16.msra.mxu1 %v1789_v14 }
 0x26d   :  { %1604 = vmatmul.mubr.bf16.vlgmr.msra.gmra.mrb[16].mxu1 %v1076_v54 }
 0x320   :  { %v1572_v15 = vpop.f32.mrb[12].mxu1 }
 0x321   :  { %v1573_v16 = vpop.f32.mrb[13].mxu1 }
 0x322   :  { %v1574_v17 = vadd.f32 %v1573_v16, %v1572_v15  ;;  %v1575_v18 = vpop.f32.mrb[14].mxu1 }
 0x323   :  { %v1576_v19 = vpop.f32.mrb[15].mxu1 }
 0x324   :  { %v1577_v20 = vadd.f32 %v1576_v19, %v1575_v18  ;;  %v1311_v22 = vadd.f32 %v1574_v17, %v1487_v21 }
 0x326   :  { %v1314_v26 = vadd.f32 %v1577_v20, %v1487_v21 }
 0x340   :  { %v1351_v23 = vpop.f32.mrb[16].mxu1 }
 0x341   :  { %v1352_v24 = vadd.f32 %v1351_v23, %v1311_v22  ;;  %v1605_v25 = vpop.f32.mrb[17].mxu1 }
 0x342   :  { %v1354_v27 = vpop.f32.mrb[18].mxu1 }
 0x343   :  { %1790 = vtanh.f32 %v1352_v24  ;;  %v1355_v28 = vadd.f32 %v1354_v27, %v1314_v26  ;;  %v1606_v29 = vpop.f32.mrb[19].mxu1 }
 0x345   :  { %1792 = vtanh.f32 %v1355_v28 }
 0x34d   :  { %v1791_v31 = vpop.eup %1790 }
 0x34e   :  { %v1361_v32 = vmul.f32 %v1791_v31, %v1360_v30 }
 0x34f   :  { %v1793_v33 = vpop.eup %1792 }
 0x350   :  { %v1362_v34 = vmul.f32 %v1793_v33, %v1360_v30  ;;  %1363 = vst [vmem:[#allocation11] sm:$0xff] %v1361_v32 }
 0x352   :  { %1364 = vst [vmem:[#allocation11 + $0x8] sm:$0xff] %v1362_v34 }
 0x353   :  { %1893 = shalt.err (!%p1890_p8)
}
 0x354   :  { %s1894_s0 = scalar_lea.hbm %s2090_s8, 256 }
 0x355   :  { %p1895_p9 = scmp.ne.s32.totalorder %s2090_s8, %s1894_s0  ;;  %p1898_p10 = scmp.lt.u32.totalorder %s1894_s0, %s2090_s8 }
 0x357   :  { %p1900_p11 = pnand %p1898_p10, %p1895_p9 }
 0x359   :  { %1903 = shalt.err (!%p1900_p11)
}
 0x35a   :  { %s1926_s23 = smov 128   ;;  %s1927_s24 = smov 8  }
 0x35b   :  { %1376 = dma.vmem_to_hbm [thread:$0]  %s1371_s17, 256, %s2090_s8, [#allocation5], %s1926_s23, %s1926_s23, %s1927_s24  }
 0x35c   :  { %1910 = dma.done.wait [#allocation5], 256  }
 0x35d   :  { %1911 = vsyncadd [#allocation5], 4294967040 }
 0x35e   :  { %1380 = vsyncpa [#allocation4], 1 }
 0x35f   :  { %1381 = vsyncpa [#allocation7], 1 }
 0x360   :  { %1382 = vsyncpa [#allocation10], 1 }
 0x361   :  { %1383 = vsyncpa [#allocation5], 1 }

</bundles_post_ra>
